<compile_context>
chip_gen: v7x
topology: tpu7x:2x2x1
jax: 0.10.0
libtpu: 0.0.40
codegen_flags: <defaults>
</compile_context>

<pallas_src>
import math
import functools

import jax
import jax.numpy as jnp
from jax.experimental import pallas as pl
from jax.experimental.pallas import tpu as pltpu


def _round_up(x, m):
    return (x + m - 1) // m * m


def _flash_self_attn_kernel(xq_ref, xk_ref, wq_ref, bq_ref, wk_ref, bk_ref,
                            wv_ref, bv_ref, o_ref,
                            q_scr, m_scr, l_scr, acc_scr,
                            *, seq_len, block_kv, mask_needed,
                            inv_sqrt_hidden, compute_dtype):
    """Grid = (batch, q_tile, kv_tile); kv_tile is the innermost reduction axis.

    xq_ref : (1, blk_q, Dp)   x rows for this q tile
    xk_ref : (1, blk_kv, Dp)  x rows for this kv tile
    w*_ref : (Dp, Hp)/(Dp, Op)  full (padded) weights
    b*_ref : (1, Hp)/(1, Op)    full (padded) biases
    o_ref  : (1, blk_q, Op)
    q_scr  : (blk_q, Hp) compute_dtype   projected Q for this q tile
    m_scr/l_scr : (blk_q, 1) f32         online-softmax running max / normalizer
    acc_scr: (blk_q, Op) f32             running weighted-V accumulator
    """
    kv_idx = pl.program_id(2)
    num_kv = pl.num_programs(2)

    @pl.when(kv_idx == 0)
    def _init():
        xq = xq_ref[0].astype(compute_dtype)
        q = jnp.dot(xq, wq_ref[...].astype(compute_dtype),
                    preferred_element_type=jnp.float32) + bq_ref[...]
        q_scr[...] = q.astype(compute_dtype)
        m_scr[...] = jnp.full_like(m_scr, -jnp.inf)
        l_scr[...] = jnp.zeros_like(l_scr)
        acc_scr[...] = jnp.zeros_like(acc_scr)

    # Project K and V for this kv tile (bf16 MXU matmuls, f32 accumulation).
    xk = xk_ref[0].astype(compute_dtype)
    k = (jnp.dot(xk, wk_ref[...].astype(compute_dtype),
                 preferred_element_type=jnp.float32) + bk_ref[...]
         ).astype(compute_dtype)
    v = (jnp.dot(xk, wv_ref[...].astype(compute_dtype),
                 preferred_element_type=jnp.float32) + bv_ref[...]
         ).astype(compute_dtype)

    # Scores (blk_q, blk_kv): contract over the hidden dim directly -- no
    # explicit transpose (feeds the MXU without an XLU transpose copy).
    s = jax.lax.dot_general(q_scr[...], k,
                            dimension_numbers=(((1,), (1,)), ((), ())),
                            preferred_element_type=jnp.float32)

    if mask_needed:
        # Mask out zero-padded kv positions (sequence padded to tile size).
        kv_pos = kv_idx * block_kv + jax.lax.broadcasted_iota(
            jnp.int32, s.shape, 1)
        s = jnp.where(kv_pos < seq_len, s, -1e30)

    # Online softmax update (f32).
    m_prev = m_scr[...]
    m_new = jnp.maximum(m_prev, jnp.max(s, axis=-1, keepdims=True))
    alpha = jnp.exp(m_prev - m_new)
    p = jnp.exp(s - m_new)
    l_scr[...] = alpha * l_scr[...] + jnp.sum(p, axis=-1, keepdims=True)
    acc_scr[...] = alpha * acc_scr[...] + jnp.dot(
        p.astype(compute_dtype), v, preferred_element_type=jnp.float32)
    m_scr[...] = m_new

    @pl.when(kv_idx == num_kv - 1)
    def _finalize():
        # Reference applies the 1/sqrt(hidden) scale AFTER the softmax:
        #   (softmax(QK^T)/sqrt(H)) @ V == (1/sqrt(H)) * softmax(QK^T) @ V
        # Fold the scale into the EUP reciprocal of the normalizer.
        scale = pl.reciprocal(l_scr[...], approx=True) * inv_sqrt_hidden
        o_ref[0] = (acc_scr[...] * scale).astype(o_ref.dtype)
    # TODO(synk): nn.Dropout (on input and on the attended output) is identity
    # in eval mode and is therefore omitted.


def self_attention(x, params, *, hidden_dim,
                   block_q=256, block_kv=256,
                   compute_dtype=jnp.bfloat16,
                   vmem_limit_bytes=48 * 1024 * 1024):
    """x: (B, S, D) float32.  params: dict of (in, out)-layout weights/biases."""
    B, S, D = x.shape
    H = params["wq"].shape[1]
    O = params["wv"].shape[1]
    assert H == hidden_dim

    # Lane-dense padding: feature dims to multiples of 128, sequence to the
    # tile size (itself a multiple of 8).  Zero padding of x / weights / bias
    # does not change Q/K/V on the real positions; padded kv rows are masked.
    Dp = _round_up(D, 128)
    Hp = _round_up(H, 128)
    Op = _round_up(O, 128)

    blk_q = min(block_q, _round_up(S, 8))
    blk_kv = min(block_kv, _round_up(S, 8))
    Sp = _round_up(S, math.lcm(blk_q, blk_kv))
    num_q = Sp // blk_q
    num_kv = Sp // blk_kv

    xp = jnp.pad(x, ((0, 0), (0, Sp - S), (0, Dp - D)))
    wq = jnp.pad(params["wq"], ((0, Dp - D), (0, Hp - H)))
    bq = jnp.pad(params["bq"], ((0, 0), (0, Hp - H)))
    wk = jnp.pad(params["wk"], ((0, Dp - D), (0, Hp - H)))
    bk = jnp.pad(params["bk"], ((0, 0), (0, Hp - H)))
    wv = jnp.pad(params["wv"], ((0, Dp - D), (0, Op - O)))
    bv = jnp.pad(params["bv"], ((0, 0), (0, Op - O)))

    kernel = functools.partial(
        _flash_self_attn_kernel,
        seq_len=S, block_kv=blk_kv, mask_needed=(Sp != S),
        inv_sqrt_hidden=1.0 / math.sqrt(hidden_dim),
        compute_dtype=compute_dtype)

    full2d = lambda shape: pl.BlockSpec(shape, lambda b, qi, ki: (0, 0))

    out_padded = pl.pallas_call(
        kernel,
        out_shape=jax.ShapeDtypeStruct((B, Sp, Op), x.dtype),
        grid_spec=pltpu.PrefetchScalarGridSpec(
            num_scalar_prefetch=0,
            grid=(B, num_q, num_kv),
            in_specs=[
                pl.BlockSpec((1, blk_q, Dp), lambda b, qi, ki: (b, qi, 0)),   # x (q rows)
                pl.BlockSpec((1, blk_kv, Dp), lambda b, qi, ki: (b, ki, 0)),  # x (kv rows)
                full2d((Dp, Hp)),                                             # Wq
                full2d((1, Hp)),                                              # bq
                full2d((Dp, Hp)),                                             # Wk
                full2d((1, Hp)),                                              # bk
                full2d((Dp, Op)),                                             # Wv
                full2d((1, Op)),                                              # bv
            ],
            out_specs=pl.BlockSpec((1, blk_q, Op), lambda b, qi, ki: (b, qi, 0)),
            scratch_shapes=[
                pltpu.VMEM((blk_q, Hp), compute_dtype),   # Q tile
                pltpu.VMEM((blk_q, 1), jnp.float32),      # m (running max)
                pltpu.VMEM((blk_q, 1), jnp.float32),      # l (normalizer)
                pltpu.VMEM((blk_q, Op), jnp.float32),     # acc
            ]),
        compiler_params=pltpu.CompilerParams(
            dimension_semantics=("parallel", "parallel", "arbitrary"),
            vmem_limit_bytes=vmem_limit_bytes),
    )(xp, xp, wq, bq, wk, bk, wv, bv)

    return out_padded[:, :S, :O]


def init_params(key, input_dim, hidden_dim, output_dim):
    """Deterministic synthetic parameters (PyTorch-Linear-like uniform init)."""
    ks = jax.random.split(key, 6)

    def lin(kw, kb, fan_in, fan_out):
        bound = 1.0 / math.sqrt(fan_in)
        w = jax.random.uniform(kw, (fan_in, fan_out), jnp.float32, -bound, bound)
        b = jax.random.uniform(kb, (1, fan_out), jnp.float32, -bound, bound)
        return w, b

    wq, bq = lin(ks[0], ks[1], input_dim, hidden_dim)
    wk, bk = lin(ks[2], ks[3], input_dim, hidden_dim)
    wv, bv = lin(ks[4], ks[5], input_dim, output_dim)
    return {"wq": wq, "bq": bq, "wk": wk, "bk": bk, "wv": wv, "bv": bv}


def self_attention_ref(x, params, *, hidden_dim):
    """Pure-JAX reference mirroring the torch forward (eval mode)."""
    q = x @ params["wq"] + params["bq"]
    k = x @ params["wk"] + params["bk"]
    v = x @ params["wv"] + params["bv"]
    s = jnp.einsum("bqh,bkh->bqk", q, k)
    attn = jax.nn.softmax(s, axis=-1) / math.sqrt(hidden_dim)
    return jnp.einsum("bqk,bko->bqo", attn, v)


if __name__ == "__main__":
    B, S = 2, 8
    input_dim, hidden_dim, output_dim = 32, 32, 32

    key = jax.random.PRNGKey(0)
    k_x, k_p = jax.random.split(key)
    x = jax.random.normal(k_x, (B, S, input_dim), jnp.float32)
    params = init_params(k_p, input_dim, hidden_dim, output_dim)

    ref = self_attention_ref(x, params, hidden_dim=hidden_dim)

    # f32 compute path (tighter check).
    out_f32 = self_attention(x, params, hidden_dim=hidden_dim,
                             compute_dtype=jnp.float32)
    out_f32 = jax.block_until_ready(out_f32)
    assert out_f32.shape == (B, S, output_dim)
    assert jnp.allclose(out_f32, ref, atol=5e-3, rtol=5e-3)

    # bf16 compute path (default, perf-oriented; looser tolerance).
    out_bf16 = self_attention(x, params, hidden_dim=hidden_dim,
                              compute_dtype=jnp.bfloat16)
    out_bf16 = jax.block_until_ready(out_bf16)
    assert out_bf16.shape == (B, S, output_dim)
    assert jnp.allclose(out_bf16, ref, atol=5e-2, rtol=5e-2)

    print("KERNEL_OK")
</pallas_src>

<mosaic_0001>
module attributes {stable_mosaic.version = 11 : i64} {
  func.func @_flash_self_attn_kernel(%arg0: i32, %arg1: i32, %arg2: i32, %arg3: memref<1x8x128xf32, #tpu.memory_space<vmem>>, %arg4: memref<1x8x128xf32, #tpu.memory_space<vmem>>, %arg5: memref<128x128xf32, #tpu.memory_space<vmem>>, %arg6: memref<1x128xf32, #tpu.memory_space<vmem>>, %arg7: memref<128x128xf32, #tpu.memory_space<vmem>>, %arg8: memref<1x128xf32, #tpu.memory_space<vmem>>, %arg9: memref<128x128xf32, #tpu.memory_space<vmem>>, %arg10: memref<1x128xf32, #tpu.memory_space<vmem>>, %arg11: memref<1x8x128xf32, #tpu.memory_space<vmem>>, %arg12: memref<8x128xf32, #tpu.memory_space<vmem>>, %arg13: memref<8x1xf32, #tpu.memory_space<vmem>>, %arg14: memref<8x1xf32, #tpu.memory_space<vmem>>, %arg15: memref<8x128xf32, #tpu.memory_space<vmem>>) attributes {dimension_semantics = [#tpu.dimension_semantics<parallel>, #tpu.dimension_semantics<parallel>, #tpu.dimension_semantics<arbitrary>], iteration_bounds = array<i64: 2, 1, 1>, scalar_prefetch = 0 : i64, scratch_operands = 4 : i64, tpu.core_type = #tpu.core_type<tc>, window_params = [{transform_indices = @transform_0, window_bounds = array<i64: 1, 8, 128>}, {transform_indices = @transform_1, window_bounds = array<i64: 1, 8, 128>}, {pipeline_mode = #tpu.pipeline_mode<synchronous>, transform_indices = @transform_2, window_bounds = array<i64: 128, 128>}, {pipeline_mode = #tpu.pipeline_mode<synchronous>, transform_indices = @transform_3, window_bounds = array<i64: 1, 128>}, {pipeline_mode = #tpu.pipeline_mode<synchronous>, transform_indices = @transform_4, window_bounds = array<i64: 128, 128>}, {pipeline_mode = #tpu.pipeline_mode<synchronous>, transform_indices = @transform_5, window_bounds = array<i64: 1, 128>}, {pipeline_mode = #tpu.pipeline_mode<synchronous>, transform_indices = @transform_6, window_bounds = array<i64: 128, 128>}, {pipeline_mode = #tpu.pipeline_mode<synchronous>, transform_indices = @transform_7, window_bounds = array<i64: 1, 128>}, {transform_indices = @transform_8, window_bounds = array<i64: 1, 8, 128>}]} {
    %c0_i32 = arith.constant 0 : i32
    %0 = arith.cmpi eq, %arg2, %c0_i32 : i32
    %1 = arith.extui %0 : i1 to i32
    %c0_i32_0 = arith.constant 0 : i32
    %2 = arith.cmpi ne, %1, %c0_i32_0 : i32
    scf.if %2 {
      %c0_32 = arith.constant 0 : index
      %c0_33 = arith.constant 0 : index
      %c0_34 = arith.constant 0 : index
      %42 = vector.load %arg3[%c0_32, %c0_33, %c0_34] : memref<1x8x128xf32, #tpu.memory_space<vmem>>, vector<1x8x128xf32>
      %43 = vector.shape_cast %42 : vector<1x8x128xf32> to vector<8x128xf32>
      %c0_35 = arith.constant 0 : index
      %c0_36 = arith.constant 0 : index
      %44 = vector.load %arg5[%c0_35, %c0_36] : memref<128x128xf32, #tpu.memory_space<vmem>>, vector<128x128xf32>
      %cst_37 = arith.constant dense<0.000000e+00> : vector<8x128xf32>
      %45 = tpu.matmul %43, %44, %cst_37 {dimension_numbers = #tpu.dot_dimension_numbers<[1], [0], [0], [1], [0, 0, 1, 1], [], []>} : vector<8x128xf32>, vector<128x128xf32>, vector<8x128xf32> -> vector<8x128xf32>
      %c0_38 = arith.constant 0 : index
      %c0_39 = arith.constant 0 : index
      %46 = vector.load %arg6[%c0_38, %c0_39] : memref<1x128xf32, #tpu.memory_space<vmem>>, vector<1x128xf32>
      %47 = vector.broadcast %46 : vector<1x128xf32> to vector<8x128xf32>
      %48 = arith.addf %45, %47 : vector<8x128xf32>
      %c0_40 = arith.constant 0 : index
      %c0_41 = arith.constant 0 : index
      %49 = vector.load %arg12[%c0_40, %c0_41] : memref<8x128xf32, #tpu.memory_space<vmem>>, vector<8x128xf32>
      tpu.vector_store %arg12[%c0_40, %c0_41], %48 {strides = array<i32>} : memref<8x128xf32, #tpu.memory_space<vmem>>, vector<8x128xf32>,
      %cst_42 = arith.constant 0xFF800000 : f32
      %50 = vector.broadcast %cst_42 : f32 to vector<8x1xf32>
      %c0_43 = arith.constant 0 : index
      %c0_44 = arith.constant 0 : index
      %51 = vector.load %arg13[%c0_43, %c0_44] : memref<8x1xf32, #tpu.memory_space<vmem>>, vector<8x1xf32>
      tpu.vector_store %arg13[%c0_43, %c0_44], %50 {strides = array<i32>} : memref<8x1xf32, #tpu.memory_space<vmem>>, vector<8x1xf32>,
      %cst_45 = arith.constant 0.000000e+00 : f32
      %52 = vector.broadcast %cst_45 : f32 to vector<8x1xf32>
      %c0_46 = arith.constant 0 : index
      %c0_47 = arith.constant 0 : index
      %53 = vector.load %arg14[%c0_46, %c0_47] : memref<8x1xf32, #tpu.memory_space<vmem>>, vector<8x1xf32>
      tpu.vector_store %arg14[%c0_46, %c0_47], %52 {strides = array<i32>} : memref<8x1xf32, #tpu.memory_space<vmem>>, vector<8x1xf32>,
      %cst_48 = arith.constant 0.000000e+00 : f32
      %54 = vector.broadcast %cst_48 : f32 to vector<8x128xf32>
      %c0_49 = arith.constant 0 : index
      %c0_50 = arith.constant 0 : index
      %55 = vector.load %arg15[%c0_49, %c0_50] : memref<8x128xf32, #tpu.memory_space<vmem>>, vector<8x128xf32>
      tpu.vector_store %arg15[%c0_49, %c0_50], %54 {strides = array<i32>} : memref<8x128xf32, #tpu.memory_space<vmem>>, vector<8x128xf32>,
    } else {
    }
    %c0 = arith.constant 0 : index
    %c0_1 = arith.constant 0 : index
    %c0_2 = arith.constant 0 : index
    %3 = vector.load %arg4[%c0, %c0_1, %c0_2] : memref<1x8x128xf32, #tpu.memory_space<vmem>>, vector<1x8x128xf32>
    %4 = vector.shape_cast %3 : vector<1x8x128xf32> to vector<8x128xf32>
    %c0_3 = arith.constant 0 : index
    %c0_4 = arith.constant 0 : index
    %5 = vector.load %arg7[%c0_3, %c0_4] : memref<128x128xf32, #tpu.memory_space<vmem>>, vector<128x128xf32>
    %cst = arith.constant dense<0.000000e+00> : vector<8x128xf32>
    %6 = tpu.matmul %4, %5, %cst {dimension_numbers = #tpu.dot_dimension_numbers<[1], [0], [0], [1], [0, 0, 1, 1], [], []>} : vector<8x128xf32>, vector<128x128xf32>, vector<8x128xf32> -> vector<8x128xf32>
    %c0_5 = arith.constant 0 : index
    %c0_6 = arith.constant 0 : index
    %7 = vector.load %arg8[%c0_5, %c0_6] : memref<1x128xf32, #tpu.memory_space<vmem>>, vector<1x128xf32>
    %8 = vector.broadcast %7 : vector<1x128xf32> to vector<8x128xf32>
    %9 = arith.addf %6, %8 : vector<8x128xf32>
    %c0_7 = arith.constant 0 : index
    %c0_8 = arith.constant 0 : index
    %10 = vector.load %arg9[%c0_7, %c0_8] : memref<128x128xf32, #tpu.memory_space<vmem>>, vector<128x128xf32>
    %cst_9 = arith.constant dense<0.000000e+00> : vector<8x128xf32>
    %11 = tpu.matmul %4, %10, %cst_9 {dimension_numbers = #tpu.dot_dimension_numbers<[1], [0], [0], [1], [0, 0, 1, 1], [], []>} : vector<8x128xf32>, vector<128x128xf32>, vector<8x128xf32> -> vector<8x128xf32>
    %c0_10 = arith.constant 0 : index
    %c0_11 = arith.constant 0 : index
    %12 = vector.load %arg10[%c0_10, %c0_11] : memref<1x128xf32, #tpu.memory_space<vmem>>, vector<1x128xf32>
    %13 = vector.broadcast %12 : vector<1x128xf32> to vector<8x128xf32>
    %14 = arith.addf %11, %13 : vector<8x128xf32>
    %c0_12 = arith.constant 0 : index
    %c0_13 = arith.constant 0 : index
    %15 = vector.load %arg12[%c0_12, %c0_13] : memref<8x128xf32, #tpu.memory_space<vmem>>, vector<8x128xf32>
    %cst_14 = arith.constant dense<0.000000e+00> : vector<8x8xf32>
    %16 = tpu.matmul %15, %9, %cst_14 {dimension_numbers = #tpu.dot_dimension_numbers<[1], [1], [0], [0], [0, 0, 1, 0], [], []>} : vector<8x128xf32>, vector<8x128xf32>, vector<8x8xf32> -> vector<8x8xf32>
    %c0_15 = arith.constant 0 : index
    %c0_16 = arith.constant 0 : index
    %17 = vector.load %arg13[%c0_15, %c0_16] : memref<8x1xf32, #tpu.memory_space<vmem>>, vector<8x1xf32>
    %cst_17 = arith.constant dense<0xFF800000> : vector<8xf32>
    %18 = vector.multi_reduction <maximumf>, %16, %cst_17 [1] : vector<8x8xf32> to vector<8xf32>
    %19 = vector.shape_cast %18 : vector<8xf32> to vector<8x1xf32>
    %20 = arith.maximumf %17, %19 : vector<8x1xf32>
    %21 = arith.subf %17, %20 : vector<8x1xf32>
    %22 = math.exp %21 : vector<8x1xf32>
    %23 = vector.broadcast %20 : vector<8x1xf32> to vector<8x8xf32>
    %24 = arith.subf %16, %23 : vector<8x8xf32>
    %25 = math.exp %24 : vector<8x8xf32>
    %c0_18 = arith.constant 0 : index
    %c0_19 = arith.constant 0 : index
    %26 = vector.load %arg14[%c0_18, %c0_19] : memref<8x1xf32, #tpu.memory_space<vmem>>, vector<8x1xf32>
    %27 = arith.mulf %22, %26 : vector<8x1xf32>
    %cst_20 = arith.constant dense<0.000000e+00> : vector<8xf32>
    %28 = vector.multi_reduction <add>, %25, %cst_20 [1] : vector<8x8xf32> to vector<8xf32>
    %29 = vector.shape_cast %28 : vector<8xf32> to vector<8x1xf32>
    %30 = arith.addf %27, %29 : vector<8x1xf32>
    %c0_21 = arith.constant 0 : index
    %c0_22 = arith.constant 0 : index
    %31 = vector.load %arg14[%c0_21, %c0_22] : memref<8x1xf32, #tpu.memory_space<vmem>>, vector<8x1xf32>
    tpu.vector_store %arg14[%c0_21, %c0_22], %30 {strides = array<i32>} : memref<8x1xf32, #tpu.memory_space<vmem>>, vector<8x1xf32>,
    %c0_23 = arith.constant 0 : index
    %c0_24 = arith.constant 0 : index
    %32 = vector.load %arg15[%c0_23, %c0_24] : memref<8x128xf32, #tpu.memory_space<vmem>>, vector<8x128xf32>
    %33 = vector.broadcast %22 : vector<8x1xf32> to vector<8x128xf32>
    %34 = arith.mulf %33, %32 : vector<8x128xf32>
    %cst_25 = arith.constant dense<0.000000e+00> : vector<8x128xf32>
    %35 = tpu.matmul %25, %14, %cst_25 {dimension_numbers = #tpu.dot_dimension_numbers<[1], [0], [0], [1], [0, 0, 1, 1], [], []>} : vector<8x8xf32>, vector<8x128xf32>, vector<8x128xf32> -> vector<8x128xf32>
    %36 = arith.addf %34, %35 : vector<8x128xf32>
    %c0_26 = arith.constant 0 : index
    %c0_27 = arith.constant 0 : index
    %37 = vector.load %arg15[%c0_26, %c0_27] : memref<8x128xf32, #tpu.memory_space<vmem>>, vector<8x128xf32>
    tpu.vector_store %arg15[%c0_26, %c0_27], %36 {strides = array<i32>} : memref<8x128xf32, #tpu.memory_space<vmem>>, vector<8x128xf32>,
    %c0_28 = arith.constant 0 : index
    %c0_29 = arith.constant 0 : index
    %38 = vector.load %arg13[%c0_28, %c0_29] : memref<8x1xf32, #tpu.memory_space<vmem>>, vector<8x1xf32>
    tpu.vector_store %arg13[%c0_28, %c0_29], %20 {strides = array<i32>} : memref<8x1xf32, #tpu.memory_space<vmem>>, vector<8x1xf32>,
    %c0_i32_30 = arith.constant 0 : i32
    %39 = arith.cmpi eq, %arg2, %c0_i32_30 : i32
    %40 = arith.extui %39 : i1 to i32
    %c0_i32_31 = arith.constant 0 : i32
    %41 = arith.cmpi ne, %40, %c0_i32_31 : i32
    scf.if %41 {
      %c0_32 = arith.constant 0 : index
      %c0_33 = arith.constant 0 : index
      %42 = vector.load %arg14[%c0_32, %c0_33] : memref<8x1xf32, #tpu.memory_space<vmem>>, vector<8x1xf32>
      %43 = tpu.reciprocal %42 {approx = true} : vector<8x1xf32> -> vector<8x1xf32>
      %cst_34 = arith.constant 0.176776692 : f32
      %44 = vector.broadcast %cst_34 : f32 to vector<8x1xf32>
      %45 = arith.mulf %43, %44 : vector<8x1xf32>
      %c0_35 = arith.constant 0 : index
      %c0_36 = arith.constant 0 : index
      %46 = vector.load %arg15[%c0_35, %c0_36] : memref<8x128xf32, #tpu.memory_space<vmem>>, vector<8x128xf32>
      %47 = vector.broadcast %45 : vector<8x1xf32> to vector<8x128xf32>
      %48 = arith.mulf %46, %47 : vector<8x128xf32>
      %c0_37 = arith.constant 0 : index
      %c0_38 = arith.constant 0 : index
      %c0_39 = arith.constant 0 : index
      %49 = vector.load %arg11[%c0_37, %c0_38, %c0_39] : memref<1x8x128xf32, #tpu.memory_space<vmem>>, vector<1x8x128xf32>
      %50 = vector.shape_cast %49 : vector<1x8x128xf32> to vector<8x128xf32>
      %51 = vector.shape_cast %48 : vector<8x128xf32> to vector<1x8x128xf32>
      tpu.vector_store %arg11[%c0_37, %c0_38, %c0_39], %51 {strides = array<i32>} : memref<1x8x128xf32, #tpu.memory_space<vmem>>, vector<1x8x128xf32>,
    } else {
    }
    return
  }
  func.func @transform_0(%arg0: i32, %arg1: i32, %arg2: i32) -> (i32, i32, i32) {
    %c0_i32 = arith.constant 0 : i32
    %c0_i32_0 = arith.constant 0 : i32
    return %arg0, %arg1, %c0_i32 : i32, i32, i32
  }
  func.func @transform_1(%arg0: i32, %arg1: i32, %arg2: i32) -> (i32, i32, i32) {
    %c0_i32 = arith.constant 0 : i32
    %c0_i32_0 = arith.constant 0 : i32
    return %arg0, %arg2, %c0_i32 : i32, i32, i32
  }
  func.func @transform_2(%arg0: i32, %arg1: i32, %arg2: i32) -> (i32, i32) {
    %c0_i32 = arith.constant 0 : i32
    %c0_i32_0 = arith.constant 0 : i32
    %c0_i32_1 = arith.constant 0 : i32
    return %c0_i32, %c0_i32_0 : i32, i32
  }
  func.func @transform_3(%arg0: i32, %arg1: i32, %arg2: i32) -> (i32, i32) {
    %c0_i32 = arith.constant 0 : i32
    %c0_i32_0 = arith.constant 0 : i32
    %c0_i32_1 = arith.constant 0 : i32
    return %c0_i32, %c0_i32_0 : i32, i32
  }
  func.func @transform_4(%arg0: i32, %arg1: i32, %arg2: i32) -> (i32, i32) {
    %c0_i32 = arith.constant 0 : i32
    %c0_i32_0 = arith.constant 0 : i32
    %c0_i32_1 = arith.constant 0 : i32
    return %c0_i32, %c0_i32_0 : i32, i32
  }
  func.func @transform_5(%arg0: i32, %arg1: i32, %arg2: i32) -> (i32, i32) {
    %c0_i32 = arith.constant 0 : i32
    %c0_i32_0 = arith.constant 0 : i32
    %c0_i32_1 = arith.constant 0 : i32
    return %c0_i32, %c0_i32_0 : i32, i32
  }
  func.func @transform_6(%arg0: i32, %arg1: i32, %arg2: i32) -> (i32, i32) {
    %c0_i32 = arith.constant 0 : i32
    %c0_i32_0 = arith.constant 0 : i32
    %c0_i32_1 = arith.constant 0 : i32
    return %c0_i32, %c0_i32_0 : i32, i32
  }
  func.func @transform_7(%arg0: i32, %arg1: i32, %arg2: i32) -> (i32, i32) {
    %c0_i32 = arith.constant 0 : i32
    %c0_i32_0 = arith.constant 0 : i32
    %c0_i32_1 = arith.constant 0 : i32
    return %c0_i32, %c0_i32_0 : i32, i32
  }
  func.func @transform_8(%arg0: i32, %arg1: i32, %arg2: i32) -> (i32, i32, i32) {
    %c0_i32 = arith.constant 0 : i32
    %c0_i32_0 = arith.constant 0 : i32
    return %arg0, %arg1, %c0_i32 : i32, i32, i32
  }
}

</mosaic_0001>

<bundles_post_ra>
// kernel: tpu_custom_call.1
= control target key start
LH: loop header
LB: loop body
LE: loop exit
PB: predicated region body
PF: predicated region fallthrough
CT: control target
= control target key end

     0   :  { %s2122_s0 = inlined_call_operand.hbm [shape: f32[2,8,128], index: 0, kind: input, shape index: {}]   ;;  %s2123_s1 = inlined_call_operand.hbm [shape: f32[2,8,128], index: 1, kind: input, shape index: {}]   ;;  %s2124_s2 = inlined_call_operand.hbm [shape: f32[128,128], index: 2, kind: input, shape index: {}]   ;;  %s2125_s3 = inlined_call_operand.vmem [shape: f32[1,128], index: 3, kind: input, shape index: {}]   ;;  %s2126_s4 = inlined_call_operand.hbm [shape: f32[128,128], index: 4, kind: input, shape index: {}]   ;;  %s2127_s5 = inlined_call_operand.vmem [shape: f32[1,128], index: 5, kind: input, shape index: {}]   ;;  %s2128_s6 = inlined_call_operand.hbm [shape: f32[128,128], index: 6, kind: input, shape index: {}]   ;;  %s2129_s7 = inlined_call_operand.vmem [shape: f32[1,128], index: 7, kind: input, shape index: {}]   ;;  %s2130_s8 = inlined_call_operand.hbm [shape: f32[2,8,128], index: 8, kind: output, shape index: {}]  }
   0x1   :  { %2138 = sst [smem:[#allocation24_spill]] %s2124_s2 }
   0x2   :  { %2139 = sst [smem:[#allocation25_spill]] %s2126_s4 }
   0x3   :  { %2140 = sst [smem:[#allocation26_spill]] %s2128_s6 }
   0x4   :  { %2141 = sst [smem:[#allocation27_spill]] %s2130_s8 }
   0x5   :  { %13 = vsyncpa [#allocation7], 0 }
   0x6   :  { %15 = vsyncpa [#allocation7 + $0x1], 0 }
   0x7   :  { %16 = vsyncpa [#allocation10], 0 }
   0x8   :  { %18 = vsyncpa [#allocation10 + $0x1], 0 }
   0x9   :  { %19 = vsyncpa [#allocation13], 0 }
   0xa   :  { %20 = vsyncpa [#allocation8], 0 }
   0xb   :  { %22 = vsyncpa [#allocation8 + $0x1], 0  ;;  %s1740_s27 = smov 0   ;;  %s1742_s28 = smov 0  }
   0xc   :  { %s1744_s29 = smov 0   ;;  %s1746_s30 = smov 0  }
   0xd   :  { %s1748_s9 = smov 0   ;;  %s1750_s10 = smov 0  }
   0xe LB: > { %2142 = sst [smem:[#allocation21_spill]] %s1660_s27  ;;  %s1771_s11 = sadd.s32 4294967295, %s1680_s10   ;;  %s1680_s10 = sphi %s1750_s10, %s28_s10   ;;  %s1676_s9 = sphi %s1748_s9, %s2173_s9   ;;  %s1672_s30 = sphi %s1746_s30, %s2172_s30   ;;  %s1668_s29 = sphi %s1744_s29, %s2171_s29   ;;  %s1664_s28 = sphi %s1742_s28, %s2170_s28   ;;  %s1660_s27 = sphi %s1740_s27, %s2169_s27  }
   0xf   : > { %2143 = sst [smem:[#allocation22_spill]] %s1672_s30  ;;  %s1062_s12 = sadd.s32 4294967294, %s1680_s10  }
  0x10   : > { %p69_p0 = scmp.ne.s32.totalorder %s1664_s28, %s1660_s27  ;;  %p2131_p1 = scmp.eq.s32.totalorder %s1771_s11, 0 }
  0x11   : > { %p255_p3 = scmp.eq.s32.totalorder %s1062_s12, 1  ;;  %p1063_p5 = scmp.ge.s32.totalorder %s1680_s10, 1 }
  0x12   : > { %p1780_p4 = por %p2131_p1, %p69_p0  ;;  %p262_p7 = scmp.lt.s32.totalorder %s1680_s10, 3 }
  0x13   : > { %p1785_p6 = por %p255_p3, %p69_p0  ;;  %s1682_s16 = smov [#allocation11]  }
  0x14   : > { %s2144_s13 = scalar_select %p1780_p4, 1, 0 }
  0x15   : > { %s2145_s14 = scalar_select %p1785_p6, 1, 0 }
  0x16   : > { %p1790_p8 = pnand %p1063_p5, %p262_p7  ;;  %s274_s17 = sshll.u32 %s1682_s16, 4  ;;  %s1794_s17 = int_to_ptr.vmem [resolvable:$true] %s274_s17 }
  0x17   : > { %2146 = sst [smem:[#allocation23_spill]] %s2145_s14  ;;  %s1683_s19 = smov [#allocation12]  }
  0x18   : > { %s2147_s15 = scalar_select %p1790_p8, 1, 0 }
  0x19   : > { %p1347_p9 = pneg %p1790_p8  ;;  %s290_s20 = sshll.u32 %s1683_s19, 4  ;;  %s1805_s20 = int_to_ptr.vmem [resolvable:$true] %s290_s20 }
  0x1a   : > { %s1684_s21 = smov [#allocation14]   ;;  %s2149_s2 = sld [smem:[#allocation24_spill]] }
  0x1b   : > { %p1801_p11 = pnand %p1347_p9, %p2131_p1  ;;  %s1807_s22 = sshll.u32 %s1684_s21, 4  ;;  %s307_s22 = int_to_ptr.vmem [resolvable:$true] %s1807_s22 }
  0x1d   : > { %p1817_p13 = pneg %p1801_p11 }
  0x20   : > { %s1442_s25 = scalar_lea.hbm %s2149_s2, 2048 }
  0x21   : > { %p1443_p12 = scmp.ne.s32.totalorder %s2149_s2, %s1442_s25  ;;  %p1449_p5 = scmp.lt.u32.totalorder %s1442_s25, %s2149_s2 }
  0x23   : > { %p1445_p0 = pnand %p1817_p13, %p1443_p12 }
  0x25   : > { %p1446_p3 = pneg %p1445_p0 }
  0x27   : > { %p1451_p7 = pnand %p1449_p5, %p1446_p3 }
  0x29   : > { %1454 = shalt.err (!%p1451_p7)
}
  0x2a   : > { %s1455_s23 = scalar_lea.vmem %s1794_s17, 2048  ;;  %p1463_p2 = scmp.lt.s32.totalorder %s1794_s17, %s1794_s17 }
  0x2b   : > { %p1456_p9 = scmp.ne.s32.totalorder %s1794_s17, %s1455_s23  ;;  %p1464_p6 = scmp.lt.s32.totalorder %s1455_s23, %s1455_s23 }
  0x2d   : > { %p1458_p10 = pnand %p1456_p9, %p1817_p13  ;;  %p1465_p12 = por %p1464_p6, %p1463_p2 }
  0x2f   : > { %p1459_p1 = pneg %p1458_p10 }
  0x31   : > { %p1466_p0 = pnand %p1465_p12, %p1459_p1 }
  0x33   : > { %1469 = shalt.err (!%p1466_p0)
}
  0x34   : > { %s1685_s24 = smov 128   ;;  %s1686_s25 = smov 8  }
  0x35   : > { %1350 = dma.hbm_to_vmem [thread:$0]  (!%p1801_p11), %s2149_s2, 2048, %s1794_s17, [#allocation10], %s1685_s24, %s1685_s24, %s1686_s25  }
  0x36   : > { %s2151_s4 = sld [smem:[#allocation25_spill]] }
  0x3c   : > { %s1470_s23 = scalar_lea.hbm %s2151_s4, 2048 }
  0x3d   : > { %p1471_p1 = scmp.ne.s32.totalorder %s2151_s4, %s1470_s23  ;;  %p1477_p10 = scmp.lt.u32.totalorder %s1470_s23, %s2151_s4 }
  0x3f   : > { %p1473_p2 = pnand %p1471_p1, %p1817_p13 }
  0x41   : > { %p1474_p6 = pneg %p1473_p2 }
  0x43   : > { %p1479_p3 = pnand %p1477_p10, %p1474_p6 }
  0x45   : > { %1482 = shalt.err (!%p1479_p3)
}
  0x46   : > { %s1483_s17 = scalar_lea.vmem %s1805_s20, 2048  ;;  %p1491_p12 = scmp.lt.s32.totalorder %s1805_s20, %s1805_s20 }
  0x47   : > { %p1484_p5 = scmp.ne.s32.totalorder %s1805_s20, %s1483_s17  ;;  %p1492_p0 = scmp.lt.s32.totalorder %s1483_s17, %s1483_s17 }
  0x49   : > { %p1486_p7 = pnand %p1484_p5, %p1817_p13  ;;  %p1493_p1 = por %p1492_p0, %p1491_p12 }
  0x4b   : > { %p1487_p9 = pneg %p1486_p7 }
  0x4d   : > { %p1494_p2 = pnand %p1493_p1, %p1487_p9 }
  0x4f   : > { %1497 = shalt.err (!%p1494_p2)
}
  0x50   : > { %1353 = dma.hbm_to_vmem [thread:$0]  (!%p1801_p11), %s2151_s4, 2048, %s1805_s20, [#allocation13], %s1685_s24, %s1685_s24, %s1686_s25  }
  0x51   : > { %s2152_s6 = sld [smem:[#allocation26_spill]] }
  0x57   : > { %s1498_s26 = scalar_lea.hbm %s2152_s6, 2048 }
  0x58   : > { %p1499_p6 = scmp.ne.s32.totalorder %s2152_s6, %s1498_s26  ;;  %p1505_p5 = scmp.lt.u32.totalorder %s1498_s26, %s2152_s6 }
  0x5a   : > { %p1501_p10 = pnand %p1499_p6, %p1817_p13 }
  0x5c   : > { %p1502_p3 = pneg %p1501_p10 }
  0x5e   : > { %p1507_p7 = pnand %p1505_p5, %p1502_p3 }
  0x60   : > { %1510 = shalt.err (!%p1507_p7)
}
  0x61   : > { %s1511_s17 = scalar_lea.vmem %s307_s22, 2048  ;;  %p1519_p1 = scmp.lt.s32.totalorder %s307_s22, %s307_s22 }
  0x62   : > { %p1512_p9 = scmp.ne.s32.totalorder %s307_s22, %s1511_s17  ;;  %p1520_p2 = scmp.lt.s32.totalorder %s1511_s17, %s1511_s17 }
  0x64   : > { %p1514_p12 = pnand %p1512_p9, %p1817_p13  ;;  %p1521_p4 = por %p1520_p2, %p1519_p1 }
  0x66   : > { %p1515_p0 = pneg %p1514_p12 }
  0x68   : > { %p1522_p8 = pnand %p1521_p4, %p1515_p0 }
  0x6a   : > { %1525 = shalt.err (!%p1522_p8)
}
  0x6b   : > { %1356 = dma.hbm_to_vmem [thread:$0]  (!%p1801_p11), %s2152_s6, 2048, %s307_s22, [#allocation13], %s1685_s24, %s1685_s24, %s1686_s25  }
  0x6c   : > { %s56_s16 = sadd.s32 1, %s1668_s29  ;;  %s47_s18 = sadd.s32 1, %s1676_s9 }
  0x6d   : > { %p63_p4 = scmp.ne.s32.totalorder %s1668_s29, %s1664_s28  ;;  %p49_p8 = scmp.ge.s32.totalorder %s47_s18, 2 }
  0x6e   : > { %p64_p13 = scmp.eq.s32.totalorder %s1680_s10, 0  ;;  %p2153_p6 = scmp.eq.s32.totalorder %s1771_s11, 1 }
  0x6f   : > { %p1371_p3 = scmp.lt.s32.totalorder %s1680_s10, 2  ;;  %s2175_s18 = smov (%p49_p8, %s47_s18), 0 }
  0x70   : > { %p1896_p10 = por %p2153_p6, %p63_p4  ;;  %p65_p5 = por %p64_p13, %p63_p4 }
  0x71   : > { %s323_s30 = sand.u32 1, %s1668_s29   ;;  %s51_s14 = ssub.s32 %s1676_s9, %s2175_s18 }
  0x72   : > { %s2154_s27 = scalar_select %p1896_p10, 1, 0 }
  0x73   : > { %p54_p11 = scmp.eq.s32.totalorder %s51_s14, 0  ;;  %s1906_s22 = sshll.u32 %s323_s30, 3 }
  0x74   : > { %s1069_s24 = sshll.u32 %s1676_s9, 7  ;;  %s327_s21 = scalar_lea.vmem [#allocation6], %s1906_s22 }
  0x75   : > { %s1910_s25 = scalar_select %p54_p11, %s1668_s29, %s56_s16  }
  0x76   : > { %s1915_s19 = scalar_lea.hbm %s2122_s0, %s1069_s24  ;;  %s335_s23 = sshll.u32 %s327_s21, 4  ;;  %s1918_s23 = int_to_ptr.vmem [resolvable:$true] %s335_s23 }
  0x77   : > { %p1922_p7 = pnand %p1371_p3, %p65_p5  ;;  %s1929_s16 = scalar_lea.hbm %s2123_s1, %s1069_s24 }
  0x78   : > { %s342_s14 = sand.u32 1, %s1680_s10   ;;  %s324_s26 = scalar_lea.sflag [#allocation7], %s323_s30 }
  0x79   : > { %s1526_s12 = scalar_lea.hbm %s1915_s19, 128  ;;  %p1528_p12 = pneg %p1922_p7 }
  0x7a   : > { %p1527_p9 = scmp.ne.s32.totalorder %s1915_s19, %s1526_s12  ;;  %s1531_s4 = scalar_lea.hbm %s2122_s0, 256 }
  0x7b   : > { %p1532_p2 = scmp.lt.u32.totalorder %s1915_s19, %s2122_s0  ;;  %p1533_p4 = scmp.lt.u32.totalorder %s1531_s4, %s1526_s12 }
  0x7c   : > { %p1529_p0 = pnand %p1528_p12, %p1527_p9  ;;  %p1535_p13 = scmp.lt.u32.totalorder %s1526_s12, %s1915_s19 }
  0x7d   : > { %p1534_p8 = por %p1533_p4, %p1532_p2 }
  0x7e   : > { %p1530_p1 = pneg %p1529_p0 }
  0x7f   : > { %p1536_p6 = por %p1535_p13, %p1534_p8 }
  0x81   : > { %p1537_p3 = pnand %p1536_p6, %p1530_p1 }
  0x83   : > { %1540 = shalt.err (!%p1537_p3)
}
  0x84   : > { %s1541_s30 = scalar_lea.vmem %s1918_s23, 128  ;;  %s1687_s2 = smov [#allocation6]  }
  0x85   : > { %p1542_p5 = scmp.ne.s32.totalorder %s1918_s23, %s1541_s30  ;;  %s1546_s24 = sshll.u32 %s1687_s2, 4  ;;  %s1547_s24 = int_to_ptr.vmem [resolvable:$false] %s1546_s24 }
  0x86   : > { %s1548_s6 = scalar_lea.vmem %s1547_s24, 256  ;;  %p1549_p0 = scmp.lt.s32.totalorder %s1918_s23, %s1547_s24 }
  0x87   : > { %p1544_p11 = pnand %p1542_p5, %p1528_p12  ;;  %p1550_p2 = scmp.lt.s32.totalorder %s1548_s6, %s1541_s30 }
  0x89   : > { %p1545_p9 = pneg %p1544_p11  ;;  %p1551_p4 = por %p1550_p2, %p1549_p0 }
  0x8b   : > { %p1552_p8 = pnand %p1551_p4, %p1545_p9 }
  0x8d   : > { %1555 = shalt.err (!%p1552_p8)
}
  0x8e   : > { %1360 = dma.hbm_to_vmem [thread:$0]  (!%p1922_p7), %s1915_s19, 128, %s1918_s23, %s324_s26  }
  0x8f   : > { %s346_s4 = scalar_lea.vmem [#allocation9], %s1906_s22  ;;  %s343_s12 = scalar_lea.sflag [#allocation10], %s342_s14 }
  0x90   : > { %s354_s8 = sshll.u32 %s346_s4, 4  ;;  %s1556_s21 = scalar_lea.hbm %s1929_s16, 128  ;;  %s355_s8 = int_to_ptr.vmem [resolvable:$true] %s354_s8 }
  0x91   : > { %p1557_p1 = scmp.ne.s32.totalorder %s1929_s16, %s1556_s21  ;;  %s1561_s2 = scalar_lea.hbm %s2123_s1, 256 }
  0x92   : > { %p1562_p3 = scmp.lt.u32.totalorder %s1929_s16, %s2123_s1  ;;  %p1563_p5 = scmp.lt.u32.totalorder %s1561_s2, %s1556_s21 }
  0x93   : > { %p1559_p13 = pnand %p1557_p1, %p1528_p12  ;;  %p1565_p9 = scmp.lt.u32.totalorder %s1556_s21, %s1929_s16 }
  0x94   : > { %p1564_p11 = por %p1563_p5, %p1562_p3 }
  0x95   : > { %p1560_p6 = pneg %p1559_p13 }
  0x96   : > { %p1566_p0 = por %p1565_p9, %p1564_p11 }
  0x98   : > { %p1567_p2 = pnand %p1566_p0, %p1560_p6 }
  0x9a   : > { %1570 = shalt.err (!%p1567_p2)
}
  0x9b   : > { %s1571_s22 = scalar_lea.vmem %s355_s8, 128  ;;  %s1688_s19 = smov [#allocation9]  }
  0x9c   : > { %p1572_p4 = scmp.ne.s32.totalorder %s355_s8, %s1571_s22  ;;  %s1576_s23 = sshll.u32 %s1688_s19, 4  ;;  %s1577_s23 = int_to_ptr.vmem [resolvable:$false] %s1576_s23 }
  0x9d   : > { %s1578_s14 = scalar_lea.vmem %s1577_s23, 256  ;;  %p1579_p13 = scmp.lt.s32.totalorder %s355_s8, %s1577_s23 }
  0x9e   : > { %p1574_p8 = pnand %p1572_p4, %p1528_p12  ;;  %p1580_p10 = scmp.lt.s32.totalorder %s1578_s14, %s1571_s22 }
  0xa0   : > { %p1575_p1 = pneg %p1574_p8  ;;  %p1581_p3 = por %p1580_p10, %p1579_p13 }
  0xa2   : > { %p1582_p5 = pnand %p1581_p3, %p1575_p1 }
  0xa4   : > { %1585 = shalt.err (!%p1582_p5)
}
  0xa5   : > { %1363 = dma.hbm_to_vmem [thread:$0]  (!%p1922_p7), %s1929_s16, 128, %s355_s8, %s343_s12  }
  0xa6   : > { %p2156_p6 = scmp.ne.s32.totalorder %s2147_s15, 0 }
  0xa7   : > { %s1982_s26 = sand.u32 (!%p2156_p6), 1, %s1664_s28   ;;  %p2157_p10 = scmp.ne.s32.totalorder (!%p2156_p6), %s2144_s13, 0 }
  0xa8   : > { %363 = sbr.rel (%p2156_p6) target bundleno = 1246 (0x4de), region = 52  ;;  %s1985_s4 = sshll.u32 (!%p2156_p6), %s1982_s26, 3 }
  0xa9   : > { %s366_s21 = scalar_lea.sflag (!%p2156_p6), [#allocation7], %s1982_s26  ;;  %s369_s20 = scalar_lea.vmem (!%p2156_p6), [#allocation6], %s1985_s4 }
  0xaf   : > { %1639 = dma.done.wait (%p2157_p10), %s366_s21, 128  }
  0xb0   : > { %1641 = vsyncadd (%p2157_p10), %s366_s21, 4294967168  ;;  %s374_s15 = sand.u32 1, %s1771_s11   ;;  %s378_s16 = scalar_lea.vmem [#allocation9], %s1985_s4 }
  0xb1   : > { %s375_s17 = scalar_lea.sflag [#allocation10], %s374_s15 }
  0xb2   : > { %1643 = dma.done.wait (%p2157_p10), %s375_s17, 128  }
  0xb3   : > { %1645 = vsyncadd (%p2157_p10), %s375_s17, 4294967168  ;;  %p2158_p7 = scmp.eq.s32.totalorder %s1771_s11, 0 }
  0xb5   : > { %1647 = dma.done.wait (%p2158_p7), [#allocation10], 2048   ;;  %p2159_p12 = pmov %p2158_p7 }
  0xb6   : > { %p2160_p11 = pmov %p2158_p7 }
  0xb7   : > { %1649 = vsyncadd (%p2159_p12), [#allocation10], 4294965248 }
  0xb8   : > { %1651 = dma.done.wait (%p2160_p11), [#allocation13], 4096   ;;  %p2161_p9 = pmov %p2158_p7 }
  0xb9   : > { %v1689_v0 = vmov 0.0|0.0   ;;  %vm1690_vm0 = vmmov 0   ;;  %v1691_v1 = vmov 0.0   ;;  %v532_v2 = vld [vmem:[#allocation12] sm:$0xff]  ;;  %v533_v3 = vld [vmem:[#allocation12 + $0x8] sm:$0xff]  ;;  %v534_v7 = vld [vmem:[#allocation12 + $0x10] sm:$0xff] }
  0xba   : > { %1653 = vsyncadd (%p2161_p9), [#allocation13], 4294963200  ;;  %1281 = vmatprep.subr.bf16.mxu1 %v1689_v0  ;;  %1257 = vmatprep.subr.bf16.mxu0 %v1689_v0  ;;  %v433_v4 = vld [vmem:[#allocation11] sm:$0xff]  ;;  %v1282_v5 = vpack.c.bf16 %v533_v3, %v532_v2  ;;  %v434_v6 = vld [vmem:[#allocation11 + $0x8] sm:$0xff]  ;;  %vm527_vm1 = vcmask 7168   ;;  %v1692_v3 = vmov -inf  }
  0xbb   : > { %1209 = vmatprep.mubr.msk.f32.mxu1 %vm1690_vm0, %v1691_v1  ;;  %1174 = vmatprep.mubr.msk.f32.mxu0 %vm1690_vm0, %v1691_v1  ;;  %v535_v8 = vld [vmem:[#allocation12 + $0x18] sm:$0xff]  ;;  %v1258_v9 = vpack.c.bf16 %v434_v6, %v433_v4  ;;  %v435_v10 = vld [vmem:[#allocation11 + $0x10] sm:$0xff]  ;;  %v536_v14 = vld [vmem:[#allocation12 + $0x20] sm:$0xff]  ;;  %528 = vst.msk [vmem:[#allocation3] sm:$0xff] %vm527_vm1, %v1692_v3  ;;  %vm790_vm2 = vcmask 64512   ;;  %s2162_s24 = sld [smem:[#allocation22_spill]] }
  0xbc   : > { %v436_v11 = vld [vmem:[#allocation11 + $0x18] sm:$0xff]  ;;  %1283 = vmatpush3.bf16.msra.mxu1 %v1282_v5  ;;  %v1285_v12 = vpack.c.bf16 %v535_v8, %v534_v7  ;;  %v537_v15 = vld [vmem:[#allocation12 + $0x28] sm:$0xff]  ;;  %v437_v16 = vld [vmem:[#allocation11 + $0x20] sm:$0xff]  ;;  %529 = vst.msk [vmem:[#allocation4] sm:$0xff] %vm527_vm1, %v1691_v1  ;;  %s427_s22 = scalar_lea.vmem [#allocation15], %s1985_s4  ;;  %s2163_s21 = sld [smem:[#allocation27_spill]] }
  0xbd   : > { %1259 = vmatpush3.bf16.msra.mxu0 %v1258_v9  ;;  %1284 = vmatprep.subr.bf16.mxu1 %v1689_v0  ;;  %v1261_v13 = vpack.c.bf16 %v436_v11, %v435_v10  ;;  %v438_v17 = vld [vmem:[#allocation11 + $0x28] sm:$0xff]  ;;  %v1288_v18 = vpack.c.bf16 %v537_v15, %v536_v14  ;;  %v538_v20 = vld [vmem:[#allocation12 + $0x30] sm:$0xff]  ;;  %v539_v21 = vld [vmem:[#allocation12 + $0x38] sm:$0xff]  ;;  %s926_s19 = sshll.u32 %s427_s22, 4  ;;  %s912_s15 = scalar_lea.sflag [#allocation8], %s1982_s26  ;;  %s2075_s19 = int_to_ptr.vmem [resolvable:$true] %s926_s19 }
  0xbe   : > { %1260 = vmatprep.subr.bf16.mxu0 %v1689_v0  ;;  %v1264_v19 = vpack.c.bf16 %v438_v17, %v437_v16  ;;  %v439_v22 = vld [vmem:[#allocation11 + $0x30] sm:$0xff]  ;;  %v440_v23 = vld [vmem:[#allocation11 + $0x38] sm:$0xff]  ;;  %v1291_v24 = vpack.c.bf16 %v539_v21, %v538_v20  ;;  %v540_v26 = vld [vmem:[#allocation12 + $0x40] sm:$0xff]  ;;  %s1586_s17 = scalar_lea.vmem %s2075_s19, 128  ;;  %p2164_p2 = scmp.ne.s32.totalorder %s2154_s27, 0 }
  0xbf   : > { %v1267_v25 = vpack.c.bf16 %v440_v23, %v439_v22  ;;  %v541_v27 = vld [vmem:[#allocation12 + $0x48] sm:$0xff]  ;;  %v441_v28 = vld [vmem:[#allocation11 + $0x40] sm:$0xff]  ;;  %v542_v32 = vld [vmem:[#allocation12 + $0x50] sm:$0xff]  ;;  %p1587_p0 = scmp.ne.s32.totalorder %s2075_s19, %s1586_s17  ;;  %s1694_s4 = smov [#allocation15]  }
  0xc0   : > { %1286 = vmatpush3.bf16.msra.mxu1 %v1285_v12  ;;  %v442_v29 = vld [vmem:[#allocation11 + $0x48] sm:$0xff]  ;;  %v1294_v30 = vpack.c.bf16 %v541_v27, %v540_v26  ;;  %v543_v33 = vld [vmem:[#allocation12 + $0x58] sm:$0xff]  ;;  %v443_v34 = vld [vmem:[#allocation11 + $0x50] sm:$0xff] }
  0xc1   : > { %1262 = vmatpush3.bf16.msra.mxu0 %v1261_v13  ;;  %1287 = vmatprep.subr.bf16.mxu1 %v1689_v0  ;;  %v1270_v31 = vpack.c.bf16 %v442_v29, %v441_v28  ;;  %v444_v35 = vld [vmem:[#allocation11 + $0x58] sm:$0xff]  ;;  %v1297_v36 = vpack.c.bf16 %v543_v33, %v542_v32  ;;  %v544_v38 = vld [vmem:[#allocation12 + $0x60] sm:$0xff]  ;;  %v545_v39 = vld [vmem:[#allocation12 + $0x68] sm:$0xff]  ;;  %s1084_s6 = sshll.u32 %s2162_s24, 7  ;;  %p1588_p4 = pnand %p1587_p0, %p2164_p2 }
  0xc2   : > { %1263 = vmatprep.subr.bf16.mxu0 %v1689_v0  ;;  %v1273_v37 = vpack.c.bf16 %v444_v35, %v443_v34  ;;  %v445_v40 = vld [vmem:[#allocation11 + $0x60] sm:$0xff]  ;;  %v446_v41 = vld [vmem:[#allocation11 + $0x68] sm:$0xff]  ;;  %v1300_v42 = vpack.c.bf16 %v545_v39, %v544_v38  ;;  %v546_v44 = vld [vmem:[#allocation12 + $0x70] sm:$0xff] }
  0xc3   : > { %v1276_v43 = vpack.c.bf16 %v446_v41, %v445_v40  ;;  %v547_v45 = vld [vmem:[#allocation12 + $0x78] sm:$0xff]  ;;  %v447_v46 = vld [vmem:[#allocation11 + $0x70] sm:$0xff]  ;;  %v432_v51 = vld [vmem:[%s369_s20] sm:$0xff]  ;;  %s2073_s20 = scalar_lea.hbm %s2163_s21, %s1084_s6  ;;  %p1589_p8 = pneg %p1588_p4 }
  0xc4   : > { %1289 = vmatpush3.bf16.msra.mxu1 %v1288_v18  ;;  %v448_v47 = vld [vmem:[#allocation11 + $0x78] sm:$0xff]  ;;  %v1303_v48 = vpack.c.bf16 %v547_v45, %v546_v44  ;;  %v1080_v52 = vld [vmem:[%s2127_s5] ss:$0 sm:$0xff]  ;;  %v625_v60 = vld [vmem:[#allocation14] sm:$0xff] }
  0xc5   : > { %1265 = vmatpush3.bf16.msra.mxu0 %v1264_v19  ;;  %1290 = vmatprep.subr.bf16.mxu1 %v1689_v0  ;;  %v1279_v49 = vpack.c.bf16 %v448_v47, %v447_v46  ;;  %v2029_v50 = vld [vmem:[%s378_s16] sm:$0xff]  ;;  %v626_v61 = vld [vmem:[#allocation14 + $0x8] sm:$0xff]  ;;  %v629_v5 = vld [vmem:[#allocation14 + $0x20] sm:$0xff]  ;;  %s1590_s16 = sshll.u32 %s1694_s4, 4  ;;  %s1591_s16 = int_to_ptr.vmem [resolvable:$false] %s1590_s16 }
  0xc6   : > { %1266 = vmatprep.subr.bf16.mxu0 %v1689_v0  ;;  %v1079_v53 = vld [vmem:[%s2125_s3] ss:$0 sm:$0xff]  ;;  %v1306_v63 = vpack.c.bf16 %v626_v61, %v625_v60  ;;  %v628_v2 = vld [vmem:[#allocation14 + $0x18] sm:$0xff]  ;;  %v630_v6 = vld [vmem:[#allocation14 + $0x28] sm:$0xff]  ;;  %s1592_s11 = scalar_lea.vmem %s1591_s16, 256  ;;  %p1593_p1 = scmp.lt.s32.totalorder %s2075_s19, %s1591_s16 }
  0xc7   : > { %v627_v62 = vld [vmem:[#allocation14 + $0x10] sm:$0xff]  ;;  %v1312_v7 = vpack.c.bf16 %v630_v6, %v629_v5  ;;  %v632_v9 = vld [vmem:[#allocation14 + $0x38] sm:$0xff]  ;;  %v633_v11 = vld [vmem:[#allocation14 + $0x40] sm:$0xff]  ;;  %p1594_p13 = scmp.lt.s32.totalorder %s1592_s11, %s1586_s17 }
  0xc8   : > { %1292 = vmatpush3.bf16.msra.mxu1 %v1291_v24  ;;  %v1309_v4 = vpack.c.bf16 %v628_v2, %v627_v62  ;;  %v631_v8 = vld [vmem:[#allocation14 + $0x30] sm:$0xff]  ;;  %v634_v12 = vld [vmem:[#allocation14 + $0x48] sm:$0xff]  ;;  %v636_v14 = vld [vmem:[#allocation14 + $0x58] sm:$0xff] }
  0xc9   : > { %1268 = vmatpush3.bf16.msra.mxu0 %v1267_v25  ;;  %1293 = vmatprep.subr.bf16.mxu1 %v1689_v0  ;;  %v1315_v10 = vpack.c.bf16 %v632_v9, %v631_v8  ;;  %v635_v13 = vld [vmem:[#allocation14 + $0x50] sm:$0xff]  ;;  %v637_v16 = vld [vmem:[#allocation14 + $0x60] sm:$0xff]  ;;  %v638_v17 = vld [vmem:[#allocation14 + $0x68] sm:$0xff]  ;;  %v1693_v25 = vmov 0   ;;  %p1595_p3 = por %p1594_p13, %p1593_p1 }
  0xca   : > { %1269 = vmatprep.subr.bf16.mxu0 %v1689_v0  ;;  %v1321_v15 = vpack.c.bf16 %v636_v14, %v635_v13  ;;  %v1324_v18 = vpack.c.bf16 %v638_v17, %v637_v16  ;;  %v639_v19 = vld [vmem:[#allocation14 + $0x70] sm:$0xff]  ;;  %v640_v20 = vld [vmem:[#allocation14 + $0x78] sm:$0xff]  ;;  %1434 = vset.pattern.permute.xlu0 %v1693_v25 }
  0xcb   : > { %v1327_v21 = vpack.c.bf16 %v640_v20, %v639_v19  ;;  %1435 = vset.pattern.permute.xlu1 %v1693_v25  ;;  %v789_v26 = vld [vmem:[#allocation3] sm:$0xff]  ;;  %v806_v40 = vld [vmem:[#allocation4] sm:$0xff]  ;;  %p1596_p5 = pnand %p1595_p3, %p1589_p8 }
  0xcc   : > { %1295 = vmatpush3.bf16.msra.mxu1 %v1294_v30 }
  0xcd   : > { %1271 = vmatpush3.bf16.msra.mxu0 %v1270_v31  ;;  %1296 = vmatprep.subr.bf16.mxu1 %v1689_v0 }
  0xce   : > { %1272 = vmatprep.subr.bf16.mxu0 %v1689_v0 }
  0xd0   : > { %1298 = vmatpush3.bf16.msra.mxu1 %v1297_v36 }
  0xd1   : > { %1274 = vmatpush3.bf16.msra.mxu0 %v1273_v37  ;;  %1299 = vmatprep.subr.bf16.mxu1 %v1689_v0 }
  0xd2   : > { %1275 = vmatprep.subr.bf16.mxu0 %v1689_v0 }
  0xd4   : > { %1301 = vmatpush3.bf16.msra.mxu1 %v1300_v42 }
  0xd5   : > { %1277 = vmatpush3.bf16.msra.mxu0 %v1276_v43  ;;  %1302 = vmatprep.subr.bf16.mxu1 %v1689_v0 }
  0xd6   : > { %1278 = vmatprep.subr.bf16.mxu0 %v1689_v0 }
  0xd8   : > { %1304 = vmatpush3.bf16.msra.mxu1 %v1303_v48 }
  0xd9   : > { %1280 = vmatpush3.bf16.msra.mxu0 %v1279_v49  ;;  %1247 = vmatprep.subr.mxu1 %v1691_v1 }
  0xda   : > { %1305 = vmatprep.subr.bf16.mxu0 %v1689_v0 }
  0xdb   : > { %1210 = vmatmul.mubr.f32.vlgmr.msra.gmra.mrb[0].mxu1 %v2029_v50 }
  0xdc   : > { %1175 = vmatmul.mubr.f32.vlgmr.msra.gmra.mrb[0].mxu0 %v432_v51  ;;  %1249 = vmatprep.mubr.msk.f32.mxu1 %vm1690_vm0, %v1691_v1 }
  0xdd   : > { %1244 = vmatprep.mubr.msk.f32.mxu0 %vm1690_vm0, %v1691_v1  ;;  %1307 = vmatpush3.bf16.msra.mxu0 %v1306_v63 }
  0xde   : > { %1308 = vmatprep.subr.bf16.mxu0 %v1689_v0 }
  0xe1   : > { %1310 = vmatpush3.bf16.msra.mxu0 %v1309_v4 }
  0xe2   : > { %1311 = vmatprep.subr.bf16.mxu0 %v1689_v0 }
  0xe5   : > { %1313 = vmatpush3.bf16.msra.mxu0 %v1312_v7 }
  0xe6   : > { %1314 = vmatprep.subr.bf16.mxu0 %v1689_v0 }
  0xe9   : > { %1316 = vmatpush3.bf16.msra.mxu0 %v1315_v10 }
  0xea   : > { %1317 = vmatprep.subr.bf16.mxu0 %v1689_v0 }
 0x1ae   : > { %v621_v54 = vpop.f32.mrb[0].mxu1 }
 0x1af   : > { %v622_v55 = vadd.f32 %v1080_v52, %v621_v54  ;;  %v1211_v56 = vpop.f32.mrb[1].mxu1  ;;  %v522_v57 = vpop.f32.mrb[0].mxu0 }
 0x1b0   : > { %v523_v58 = vadd.f32 %v1079_v53, %v522_v57  ;;  %v1176_v59 = vpop.f32.mrb[1].mxu0 }
 0x1b1   : > { %1248 = vmatpush3.xpose.msra.mxu1 %v622_v55 }
 0x1b2   : > { %1252 = vmatprep.subr.mxu1 %v1691_v1 }
 0x1b4   : > { %1250 = vmatmul.mubr.f32.vlgmr.msra.gmra.mrb[2].mxu1 %v523_v58 }
 0x1b5   : > { %1254 = vmatprep.mubr.msk.f32.mxu1 %vm1690_vm0, %v1691_v1  ;;  %v1318_v1 = vpack.c.bf16 %v634_v12, %v633_v11 }
 0x1b7   : > { %1319 = vmatpush3.bf16.msra.mxu0 %v1318_v1 }
 0x1b8   : > { %1320 = vmatprep.subr.bf16.mxu0 %v1689_v0 }
 0x1bb   : > { %1322 = vmatpush3.bf16.msra.mxu0 %v1321_v15 }
 0x1bc   : > { %1323 = vmatprep.subr.bf16.mxu0 %v1689_v0 }
 0x1bf   : > { %1325 = vmatpush3.bf16.msra.mxu0 %v1324_v18 }
 0x1c0   : > { %1326 = vmatprep.subr.bf16.mxu0 %v1689_v0  ;;  %v1081_v0 = vld [vmem:[%s2129_s7] ss:$0 sm:$0xff] }
 0x1c3   : > { %1328 = vmatpush3.bf16.msra.mxu0 %v1327_v21 }
 0x1c6   : > { %1245 = vmatmul.mubr.f32.vlgmr.msra.gmra.mrb[2].mxu0 %v2029_v50 }
 0x287   : > { %v785_v22 = vpop.f32.mrb[2].mxu1 }
 0x288   : > { %v1251_v23 = vpop.f32.mrb[3].mxu1  ;;  %v791_v24 = vsel %vm790_vm2, %v785_v22, -inf }
 0x289   : > { %792 = vmax.xlane.f32.xlu0 %v791_v24 }
 0x299   : > { %v714_v30 = vpop.f32.mrb[2].mxu0 }
 0x29a   : > { %v715_v31 = vadd.f32 %v1081_v0, %v714_v30  ;;  %v1246_v32 = vpop.f32.mrb[3].mxu0 }
 0x29c   : > { %1253 = vmatpush3.msra.mxu1 %v715_v31 }
 0x316   : > { %v793_v27 = vpop.xlane.xlu0 %792 }
 0x317   : > { %v794_v28 = vmax.f32 %v789_v26, %v793_v27 }
 0x319   : > { %v795_v29 = vsub.f32 %v789_v26, %v794_v28  ;;  %896 = vst.msk [vmem:[#allocation3] sm:$0xff] %vm527_vm1, %v794_v28  ;;  %800 = vperm.xlu0 %1434, %v794_v28  }
 0x31b   : > { %v796_v38 = vmul.f32 1.442695, %v795_v29 }
 0x398   : > { %v801_v33 = vpop.permute.xlu0 %800 }
 0x399   : > { %v803_v34 = vsub.f32 %v785_v22, %v801_v33 }
 0x39b   : > { %v804_v35 = vmul.f32 1.442695, %v803_v34 }
 0x39d   : > { %1436 = vpow2.f32 %v804_v35 }
 0x39e   : > { %1438 = vpow2.f32 %v796_v38 }
 0x3a7   : > { %v1437_v36 = vpop.eup %1436 }
 0x3a8   : > { %1255 = vmatmul.mubr.msk.f32.vlgmr.msra.gmra.mrb[4].mxu1 %vm790_vm2, %v1437_v36  ;;  %v808_v37 = vsel %vm790_vm2, %v1437_v36, 0.0  ;;  %v1439_v39 = vpop.eup %1438 }
 0x3a9   : > { %809 = vadd.xlane.f32.xlu1 %v808_v37  ;;  %v807_v41 = vmul.f32 %v1439_v39, %v806_v40 }
 0x3ba   : > { %817 = vperm.xlu1 %1435, %v1439_v39  }
 0x436   : > { %v810_v42 = vpop.xlane.xlu1 %809 }
 0x437   : > { %v811_v43 = vadd.f32 %v810_v42, %v807_v41 }
 0x439   : > { %813 = vst.msk [vmem:[#allocation4] sm:$0xff] %vm527_vm1, %v811_v43 }
 0x43a   : > { %v818_v49 = vpop.permute.xlu1 %817 }
 0x43b   : > { %v820_v50 = vmul.f32 0.0, %v818_v49 }
 0x440   : > { %v900_v44 = vld [vmem:[#allocation4] sm:$0xff] }
 0x441   : > { %1440 = vrcp.f32 %v900_v44 }
 0x44b   : > { %v1441_v45 = vpop.eup %1440 }
 0x44c   : > { %v902_v46 = vmul.f32 0.17677669, %v1441_v45 }
 0x44e   : > { %906 = vperm.xlu1 %1435, %v902_v46  }
 0x47b   : > { %v890_v47 = vpop.f32.mrb[4].mxu1 }
 0x47c   : > { %v1256_v48 = vpop.f32.mrb[5].mxu1  ;;  %v894_v51 = vadd.f32 %v890_v47, %v820_v50 }
 0x4cd   : > { %v907_v52 = vpop.permute.xlu1 %906 }
 0x4ce   : > { %v909_v53 = vmul.f32 %v907_v52, %v894_v51 }
 0x4d0   : > { %910 = vst [vmem:[%s427_s22] sm:$0xff] %v909_v53 }
 0x4d1   : > { %1599 = shalt.err (!%p1596_p5)
}
 0x4d2   : > { %s1600_s26 = scalar_lea.hbm %s2073_s20, 128  ;;  %s1604_s12 = scalar_lea.hbm %s2163_s21, 256 }
 0x4d3   : > { %p1601_p6 = scmp.ne.s32.totalorder %s2073_s20, %s1600_s26  ;;  %p1605_p12 = scmp.lt.u32.totalorder %s2073_s20, %s2163_s21 }
 0x4d4   : > { %p1606_p11 = scmp.lt.u32.totalorder %s1604_s12, %s1600_s26  ;;  %p1608_p0 = scmp.lt.u32.totalorder %s1600_s26, %s2073_s20 }
 0x4d5   : > { %p1602_p10 = pnand %p1601_p6, %p2164_p2 }
 0x4d6   : > { %p1607_p9 = por %p1606_p11, %p1605_p12 }
 0x4d7   : > { %p1603_p7 = pneg %p1602_p10 }
 0x4d8   : > { %p1609_p4 = por %p1608_p0, %p1607_p9 }
 0x4da   : > { %p1610_p8 = pnand %p1609_p4, %p1603_p7 }
 0x4dc   : > { %1613 = shalt.err (!%p1610_p8)
}
 0x4dd   : > { %1345 = dma.vmem_to_hbm [thread:$0]  (%p2164_p2), %s2075_s19, 128, %s2073_s20, %s912_s15  }
 0x4de PF: > { %s2165_s24 = sld [smem:[#allocation21_spill]]  ;;  %s2166_s6 = sld [smem:[#allocation23_spill]] }
 0x4df   : > { %p2168_p13 = scmp.ge.s32.totalorder %s1680_s10, 2 }
 0x4e4   : > { %s938_s22 = sand.u32 1, %s2165_s24   ;;  %p2167_p1 = scmp.ne.s32.totalorder %s2166_s6, 0 }
 0x4e5   : > { %s939_s23 = scalar_lea.sflag [#allocation8], %s938_s22 }
 0x4e6   : > { %p1365_p3 = pnand %p2168_p13, %p2167_p1 }
 0x4e8   : > { %1655 = dma.done.wait (!%p1365_p3), %s939_s23, 128  }
 0x4e9   : > { %1657 = vsyncadd (!%p1365_p3), %s939_s23, 4294967168  ;;  %s28_s10 = sadd.s32 1, %s1680_s10   ;;  %s2169_s27 = smov %s1664_s28 }
 0x4ea   : > { %p25_p5 = scmp.ge.s32.totalorder %s28_s10, 4   ;;  %s2170_s28 = smov %s1668_s29 }
 0x4eb   : > { %s2171_s29 = smov %s1910_s25  ;;  %s2172_s30 = smov %s1676_s9 }
 0x4ec   : > { %s2173_s9 = smov %s2175_s18  ;;  %27 = sbr.rel (!%p25_p5) target bundleno = 14 (0xe), region = 130 }
 0x4f3   :  { %944 = vsyncpa [#allocation7], 1 }
 0x4f4   :  { %946 = vsyncpa [#allocation7 + $0x1], 1 }
 0x4f5   :  { %947 = vsyncpa [#allocation10], 1 }
 0x4f6   :  { %949 = vsyncpa [#allocation10 + $0x1], 1 }
 0x4f7   :  { %950 = vsyncpa [#allocation13], 1 }
 0x4f8   :  { %951 = vsyncpa [#allocation8], 1 }
 0x4f9   :  { %953 = vsyncpa [#allocation8 + $0x1], 1 }

</bundles_post_ra>
